<compile_context>
chip_gen: v7x
topology: tpu7x:2x2x1
jax: 0.10.0
libtpu: 0.0.40
codegen_flags: <defaults>
</compile_context>

<pallas_src>
import jax
import jax.numpy as jnp
from jax.experimental import pallas as pl
from jax.experimental.pallas import tpu as pltpu


_EPS = 1e-8  # torch.nn.functional.cosine_similarity default eps (clamped per-norm)


def _combined_similarity_kernel(q_ref, s_ref, lex_ref, w_ref, b_ref, out_ref):
    """Single invocation over all streams.

    q_ref   : VMEM (1, D)     query embedding (lane-dense row)
    s_ref   : VMEM (N, S, D)  sentence embeddings for all streams
    lex_ref : VMEM (N, 1)     lexical/topic similarity per stream
    w_ref   : SMEM (2,)       nn.Linear(2, 1) weight row [w_semantic, w_lexical]
    b_ref   : SMEM (1,)       nn.Linear bias
    out_ref : VMEM (N, 128)   lane-broadcast final score per stream
    """
    q = q_ref[...]                                   # (1, D)
    s = s_ref[...]                                   # (N, S, D)

    # --- cosine similarity: VPU multiply + lane (XLU) reductions, no MXU ----------------
    dots = jnp.sum(s * q[None, :, :], axis=-1)                     # (N, S)
    s_norm = jnp.sqrt(jnp.sum(s * s, axis=-1))                     # (N, S)
    q_norm = jnp.sqrt(jnp.sum(q * q, axis=-1, keepdims=True))      # (1, 1)
    denom = jnp.maximum(s_norm, _EPS) * jnp.maximum(q_norm, _EPS)  # per-norm clamp (torch)
    cos = dots / denom                                             # (N, S)

    # --- relu ---------------------------------------------------------------------------
    sim = jnp.maximum(cos, 0.0)                                    # (N, S)

    # --- 1 - prod(1 - sim): static lane-halving multiply tree (S is a power of two,
    #     wrapper pads with zero embeddings -> one_minus == 1 on pads, neutral) ----------
    p = 1.0 - sim                                                  # no clamp: matches torch.prod
    width = p.shape[-1]
    while width > 1:
        half = width // 2
        p = p[:, :half] * p[:, half:width]
        width = half
    semantic = 1.0 - p                                             # (N, 1)

    # --- Linear(2, 1) + Sigmoid, vectorized across all streams ---------------------------
    lex = lex_ref[...]                                             # (N, 1)
    z = w_ref[0] * semantic + w_ref[1] * lex + b_ref[0]            # (N, 1)
    y = 1.0 / (1.0 + jnp.exp(-z))                                  # sigmoid (EUP exp, one vreg)

    out_ref[...] = jnp.broadcast_to(y, out_ref.shape)              # one lane-dense store


def combined_similarity(query_emb, sent_embs, lexical, w, b):
    """Pallas equivalent of CustomSentenceTransformer.forward on precomputed embeddings."""
    N, S, D = sent_embs.shape

    # Pad the sentence axis to a power of two with zero embeddings; zero rows give cos = 0
    # (after the eps clamp) -> relu -> one_minus = 1 -> neutral in the product tree.
    s_pad = max(int(pl.next_power_of_2(max(S, 1))), 1)
    if s_pad != S:
        sent_embs = jnp.concatenate(
            [sent_embs, jnp.zeros((N, s_pad - S, D), sent_embs.dtype)], axis=1)

    q_row = query_emb.reshape(1, D).astype(jnp.float32)
    sent_f32 = sent_embs.astype(jnp.float32)
    lex_col = lexical.reshape(N, 1).astype(jnp.float32)

    # Whole working set fits in VMEM -> gridless single step, one contiguous DMA per operand.
    # TODO(synk): for large N, block the stream axis (multiples of 8) into a 1-D grid marked
    # "parallel" so v7x can shard it across both TensorCores, and store embeddings in bf16.
    out = pl.pallas_call(
        _combined_similarity_kernel,
        out_shape=jax.ShapeDtypeStruct((N, 128), jnp.float32),
        in_specs=[
            pl.BlockSpec(memory_space=pltpu.VMEM),   # query row (1, D)
            pl.BlockSpec(memory_space=pltpu.VMEM),   # sentence embeddings (N, S, D)
            pl.BlockSpec(memory_space=pltpu.VMEM),   # lexical sims (N, 1)
            pl.BlockSpec(memory_space=pltpu.SMEM),   # linear weight (2,)
            pl.BlockSpec(memory_space=pltpu.SMEM),   # linear bias (1,)
        ],
        out_specs=pl.BlockSpec(memory_space=pltpu.VMEM),
    )(q_row, sent_f32, lex_col, w.astype(jnp.float32), b.astype(jnp.float32))

    # mirrors output.squeeze() in the torch module -> shape (N,)
    return out[:, 0]


def _reference(query_emb, sent_embs, lexical, w, b):
    """Plain-JAX reference of the same math (for a sanity check)."""
    dots = jnp.einsum("nsd,d->ns", sent_embs, query_emb)              # (N, S)
    s_norm = jnp.linalg.norm(sent_embs, axis=-1)                      # (N, S)
    q_norm = jnp.linalg.norm(query_emb)                               # ()
    cos = dots / (jnp.maximum(s_norm, _EPS) * jnp.maximum(q_norm, _EPS))
    sim = jax.nn.relu(cos)
    semantic = 1.0 - jnp.prod(1.0 - sim, axis=-1)                     # (N,)
    z = w[0] * semantic + w[1] * lexical + b[0]
    return jax.nn.sigmoid(z)


if __name__ == "__main__":
    key = jax.random.PRNGKey(0)
    k1, k2, k3 = jax.random.split(key, 3)

    N, S, D = 8, 16, 128      # document streams, sentences per stream, embedding dim
    sent_embs = jax.random.normal(k1, (N, S, D), dtype=jnp.float32)
    query_emb = jax.random.normal(k2, (D,), dtype=jnp.float32)
    lexical = jax.random.uniform(k3, (N,), dtype=jnp.float32)

    # Deterministic nn.Linear(in=2, out=1, bias=True) parameters.
    w = jnp.array([0.6, -0.4], dtype=jnp.float32)   # weight row
    b = jnp.array([0.05], dtype=jnp.float32)        # bias

    out = combined_similarity(query_emb, sent_embs, lexical, w, b)
    out = jax.block_until_ready(out)

    ref = _reference(query_emb, sent_embs, lexical, w, b)
    assert out.shape == (N,)
    assert jnp.allclose(out, ref, rtol=1e-4, atol=1e-5), (out, ref)

    print("KERNEL_OK")
</pallas_src>

<mosaic_0001>
module attributes {stable_mosaic.version = 11 : i64} {
  func.func @_combined_similarity_kernel(%arg0: memref<1x128xf32, #tpu.memory_space<vmem>>, %arg1: memref<8x16x128xf32, #tpu.memory_space<vmem>>, %arg2: memref<8x1xf32, #tpu.memory_space<vmem>>, %arg3: memref<2xf32, #tpu.memory_space<smem>>, %arg4: memref<1xf32, #tpu.memory_space<smem>>, %arg5: memref<8x128xf32, #tpu.memory_space<vmem>>) attributes {dimension_semantics = [], scalar_prefetch = 0 : i64, scratch_operands = 0 : i64, tpu.core_type = #tpu.core_type<tc>} {
    %c0 = arith.constant 0 : index
    %c0_0 = arith.constant 0 : index
    %0 = vector.load %arg0[%c0, %c0_0] : memref<1x128xf32, #tpu.memory_space<vmem>>, vector<1x128xf32>
    %c0_1 = arith.constant 0 : index
    %c0_2 = arith.constant 0 : index
    %c0_3 = arith.constant 0 : index
    %1 = vector.load %arg1[%c0_1, %c0_2, %c0_3] : memref<8x16x128xf32, #tpu.memory_space<vmem>>, vector<8x16x128xf32>
    %2 = vector.shape_cast %0 : vector<1x128xf32> to vector<1x1x128xf32>
    %3 = vector.broadcast %2 : vector<1x1x128xf32> to vector<8x16x128xf32>
    %4 = arith.mulf %1, %3 : vector<8x16x128xf32>
    %cst = arith.constant dense<0.000000e+00> : vector<8x16xf32>
    %5 = vector.multi_reduction <add>, %4, %cst [2] : vector<8x16x128xf32> to vector<8x16xf32>
    %6 = arith.mulf %1, %1 : vector<8x16x128xf32>
    %cst_4 = arith.constant dense<0.000000e+00> : vector<8x16xf32>
    %7 = vector.multi_reduction <add>, %6, %cst_4 [2] : vector<8x16x128xf32> to vector<8x16xf32>
    %8 = math.sqrt %7 : vector<8x16xf32>
    %9 = arith.mulf %0, %0 : vector<1x128xf32>
    %cst_5 = arith.constant dense<0.000000e+00> : vector<1xf32>
    %10 = vector.multi_reduction <add>, %9, %cst_5 [1] : vector<1x128xf32> to vector<1xf32>
    %11 = vector.shape_cast %10 : vector<1xf32> to vector<1x1xf32>
    %12 = math.sqrt %11 : vector<1x1xf32>
    %cst_6 = arith.constant 9.99999993E-9 : f32
    %13 = vector.broadcast %cst_6 : f32 to vector<8x16xf32>
    %14 = arith.maximumf %8, %13 : vector<8x16xf32>
    %cst_7 = arith.constant 9.99999993E-9 : f32
    %15 = vector.broadcast %cst_7 : f32 to vector<1x1xf32>
    %16 = arith.maximumf %12, %15 : vector<1x1xf32>
    %17 = vector.broadcast %16 : vector<1x1xf32> to vector<8x16xf32>
    %18 = arith.mulf %14, %17 : vector<8x16xf32>
    %19 = arith.divf %5, %18 : vector<8x16xf32>
    %cst_8 = arith.constant 0.000000e+00 : f32
    %20 = vector.broadcast %cst_8 : f32 to vector<8x16xf32>
    %21 = arith.maximumf %19, %20 : vector<8x16xf32>
    %cst_9 = arith.constant 1.000000e+00 : f32
    %22 = vector.broadcast %cst_9 : f32 to vector<8x16xf32>
    %23 = arith.subf %22, %21 : vector<8x16xf32>
    %24 = vector.extract_strided_slice %23 {offsets = [0, 0], sizes = [8, 8], strides = [1, 1]} : vector<8x16xf32> to vector<8x8xf32>
    %25 = vector.extract_strided_slice %23 {offsets = [0, 8], sizes = [8, 8], strides = [1, 1]} : vector<8x16xf32> to vector<8x8xf32>
    %26 = arith.mulf %24, %25 : vector<8x8xf32>
    %27 = vector.extract_strided_slice %26 {offsets = [0, 0], sizes = [8, 4], strides = [1, 1]} : vector<8x8xf32> to vector<8x4xf32>
    %28 = vector.extract_strided_slice %26 {offsets = [0, 4], sizes = [8, 4], strides = [1, 1]} : vector<8x8xf32> to vector<8x4xf32>
    %29 = arith.mulf %27, %28 : vector<8x4xf32>
    %30 = vector.extract_strided_slice %29 {offsets = [0, 0], sizes = [8, 2], strides = [1, 1]} : vector<8x4xf32> to vector<8x2xf32>
    %31 = vector.extract_strided_slice %29 {offsets = [0, 2], sizes = [8, 2], strides = [1, 1]} : vector<8x4xf32> to vector<8x2xf32>
    %32 = arith.mulf %30, %31 : vector<8x2xf32>
    %33 = vector.extract_strided_slice %32 {offsets = [0, 0], sizes = [8, 1], strides = [1, 1]} : vector<8x2xf32> to vector<8x1xf32>
    %34 = vector.extract_strided_slice %32 {offsets = [0, 1], sizes = [8, 1], strides = [1, 1]} : vector<8x2xf32> to vector<8x1xf32>
    %35 = arith.mulf %33, %34 : vector<8x1xf32>
    %cst_10 = arith.constant 1.000000e+00 : f32
    %36 = vector.broadcast %cst_10 : f32 to vector<8x1xf32>
    %37 = arith.subf %36, %35 : vector<8x1xf32>
    %c0_11 = arith.constant 0 : index
    %c0_12 = arith.constant 0 : index
    %38 = vector.load %arg2[%c0_11, %c0_12] : memref<8x1xf32, #tpu.memory_space<vmem>>, vector<8x1xf32>
    %c0_13 = arith.constant 0 : index
    %39 = memref.load %arg3[%c0_13] : memref<2xf32, #tpu.memory_space<smem>>
    %40 = vector.broadcast %39 : f32 to vector<8x1xf32>
    %41 = arith.mulf %40, %37 : vector<8x1xf32>
    %c1 = arith.constant 1 : index
    %42 = memref.load %arg3[%c1] : memref<2xf32, #tpu.memory_space<smem>>
    %43 = vector.broadcast %42 : f32 to vector<8x1xf32>
    %44 = arith.mulf %43, %38 : vector<8x1xf32>
    %45 = arith.addf %41, %44 : vector<8x1xf32>
    %c0_14 = arith.constant 0 : index
    %46 = memref.load %arg4[%c0_14] : memref<1xf32, #tpu.memory_space<smem>>
    %47 = vector.broadcast %46 : f32 to vector<8x1xf32>
    %48 = arith.addf %45, %47 : vector<8x1xf32>
    %cst_15 = arith.constant 0.000000e+00 : f32
    %49 = vector.broadcast %cst_15 : f32 to vector<8x1xf32>
    %50 = arith.subf %49, %48 : vector<8x1xf32>
    %51 = math.exp %50 : vector<8x1xf32>
    %cst_16 = arith.constant 1.000000e+00 : f32
    %52 = vector.broadcast %cst_16 : f32 to vector<8x1xf32>
    %53 = arith.addf %52, %51 : vector<8x1xf32>
    %cst_17 = arith.constant 1.000000e+00 : f32
    %54 = vector.broadcast %cst_17 : f32 to vector<8x1xf32>
    %55 = arith.divf %54, %53 : vector<8x1xf32>
    %56 = vector.shape_cast %55 : vector<8x1xf32> to vector<8x1xf32>
    %57 = vector.broadcast %56 : vector<8x1xf32> to vector<8x128xf32>
    %c0_18 = arith.constant 0 : index
    %c0_19 = arith.constant 0 : index
    %58 = vector.load %arg5[%c0_18, %c0_19] : memref<8x128xf32, #tpu.memory_space<vmem>>, vector<8x128xf32>
    tpu.vector_store %arg5[%c0_18, %c0_19], %57 {strides = array<i32>} : memref<8x128xf32, #tpu.memory_space<vmem>>, vector<8x128xf32>,
    return
  }
}

</mosaic_0001>

<bundles_post_ra>
// kernel: tpu_custom_call.1
= control target key start
LH: loop header
LB: loop body
LE: loop exit
PB: predicated region body
PF: predicated region fallthrough
CT: control target
= control target key end

     0   :  { %11 = vsyncpa [#allocation4], 0  ;;  %s1235_s0 = inlined_call_operand.vmem [shape: f32[1,128], index: 0, kind: input, shape index: {}]   ;;  %s1236_s1 = inlined_call_operand.hbm [shape: f32[8,16,128], index: 1, kind: input, shape index: {}]   ;;  %s1237_s2 = inlined_call_operand.vmem [shape: f32[8,1], index: 2, kind: input, shape index: {}]   ;;  %s1238_s3 = inlined_call_operand.vmem [shape: f32[2], index: 3, kind: input, shape index: {}]   ;;  %s1239_s4 = inlined_call_operand.<no memory space> [shape: f32[1], index: 4, kind: input, shape index: {}]   ;;  %s1240_s5 = inlined_call_operand.hbm [shape: f32[8,128], index: 5, kind: output, shape index: {}]  }
   0x1   :  { %12 = vsyncpa [#allocation6], 0 }
   0x2   :  { %13 = vsyncpa [#allocation5], 0  ;;  %s915_s18 = smov [#allocation3]   ;;  %s36_s22 = sshll.u32 %s1238_s3, 4  ;;  %s37_s22 = int_to_ptr.vmem [resolvable:$true] %s36_s22 }
   0x3   :  { %s21_s19 = sshll.u32 %s915_s18, 4  ;;  %s853_s25 = scalar_lea.hbm %s1236_s1, 2048  ;;  %s22_s19 = int_to_ptr.vmem [resolvable:$true] %s21_s19 }
   0x4   :  { %p854_p0 = scmp.ne.s32.totalorder %s1236_s1, %s853_s25  ;;  %p857_p1 = scmp.lt.u32.totalorder %s853_s25, %s1236_s1 }
   0x6   :  { %p859_p2 = pnand %p857_p1, %p854_p0 }
   0x8   :  { %862 = shalt.err (!%p859_p2)
}
   0x9   :  { %s863_s30 = scalar_lea.vmem %s22_s19, 2048  ;;  %p868_p4 = scmp.lt.s32.totalorder %s22_s19, %s22_s19 }
   0xa   :  { %p864_p3 = scmp.ne.s32.totalorder %s22_s19, %s863_s30  ;;  %p869_p5 = scmp.lt.s32.totalorder %s863_s30, %s863_s30 }
   0xc   :  { %p870_p6 = por %p869_p5, %p868_p4 }
   0xe   :  { %p871_p7 = pnand %p870_p6, %p864_p3 }
  0x10   :  { %874 = shalt.err (!%p871_p7)
}
  0x11   :  { %s916_s3 = smov 128   ;;  %s917_s6 = smov 8  }
  0x12   :  { %27 = dma.hbm_to_vmem [thread:$0]  %s1236_s1, 2048, %s22_s19, [#allocation4], %s916_s3, %s916_s3, %s917_s6  }
  0x13   :  { %s875_s9 = scalar_lea.vmem %s37_s22, 16  ;;  %p880_p9 = scmp.lt.s32.totalorder %s37_s22, %s37_s22 }
  0x14   :  { %p876_p8 = scmp.ne.s32.totalorder %s37_s22, %s875_s9  ;;  %p881_p10 = scmp.lt.s32.totalorder %s875_s9, %s875_s9 }
  0x16   :  { %p882_p11 = por %p881_p10, %p880_p9 }
  0x18   :  { %p883_p12 = pnand %p882_p11, %p876_p8 }
  0x1a   :  { %886 = shalt.err (!%p883_p12)
}
  0x1b   :  { %s918_s10 = smov [#allocation7]  }
  0x1c   :  { %39 = dma.vmem_to_smem %s37_s22, 16, %s918_s10, [#allocation6]  }
  0x1d   :  { %909 = dma.done.wait [#allocation4], 2048  }
  0x1e   :  { %910 = vsyncadd [#allocation4], 4294965248 }
  0x1f   :  { %911 = dma.done.wait [#allocation6], 16  }
  0x20   :  { %912 = vsyncadd [#allocation6], 4294967280 }
  0x21   :  { %48 = sfence }
  0x22   :  { %v51_v0 = vld [vmem:[#allocation3 + $0x8] sm:$0xff]  ;;  %v50_v1 = vld [vmem:[#allocation3] sm:$0xff]  ;;  %v52_v2 = vld [vmem:[#allocation3 + $0x10] sm:$0xff]  ;;  %vm281_vm0 = vcmask 1040384   ;;  %v67_v19 = vlaneseq }
  0x23   :  { %v121_v3 = vmul.f32 %v51_v0, %v51_v0  ;;  %v120_v4 = vmul.f32 %v50_v1, %v50_v1  ;;  %v49_v5 = vld [vmem:[%s1235_s0] sm:$0x1]  ;;  %v122_v7 = vmul.f32 %v52_v2, %v52_v2  ;;  %v53_v10 = vld [vmem:[#allocation3 + $0x18] sm:$0xff]  ;;  %v56_v13 = vld [vmem:[#allocation3 + $0x30] sm:$0xff]  ;;  %s746_s0 = sld [smem:[#allocation7 + $0x1]] }
  0x24   :  { %v280_v6 = vmul.f32 %v49_v5, %v49_v5  ;;  %v54_v9 = vld [vmem:[#allocation3 + $0x20] sm:$0xff]  ;;  %v123_v12 = vmul.f32 %v53_v10, %v53_v10  ;;  %v55_v14 = vld [vmem:[#allocation3 + $0x28] sm:$0xff]  ;;  %v126_v15 = vmul.f32 %v56_v13, %v56_v13  ;;  %v57_v18 = vld [vmem:[#allocation3 + $0x38] sm:$0xff]  ;;  %v969_v24 = vshrl.u32 %v67_v19, 7 }
  0x25   :  { %138 = vadd.xlane.f32.xlu1 %v121_v3  ;;  %136 = vadd.xlane.f32.xlu0 %v120_v4  ;;  %v124_v11 = vmul.f32 %v54_v9, %v54_v9  ;;  %v125_v16 = vmul.f32 %v55_v14, %v55_v14  ;;  %v58_v17 = vld [vmem:[#allocation3 + $0x40] sm:$0xff]  ;;  %v127_v21 = vmul.f32 %v57_v18, %v57_v18  ;;  %v60_v22 = vld [vmem:[#allocation3 + $0x50] sm:$0xff]  ;;  %v59_v23 = vld [vmem:[#allocation3 + $0x48] sm:$0xff] }
  0x26   :  { %v282_v8 = vsel %vm281_vm0, %v280_v6, 0.0  ;;  %v128_v20 = vmul.f32 %v58_v17, %v58_v17  ;;  %v130_v25 = vmul.f32 %v60_v22, %v60_v22  ;;  %v129_v26 = vmul.f32 %v59_v23, %v59_v23  ;;  %v62_v27 = vld [vmem:[#allocation3 + $0x60] sm:$0xff]  ;;  %v61_v28 = vld [vmem:[#allocation3 + $0x58] sm:$0xff]  ;;  %v64_v32 = vld [vmem:[#allocation3 + $0x70] sm:$0xff] }
  0x27   :  { %v972_v29 = vsub.s32 0, %v969_v24  ;;  %v132_v30 = vmul.f32 %v62_v27, %v62_v27  ;;  %v131_v31 = vmul.f32 %v61_v28, %v61_v28  ;;  %v63_v33 = vld [vmem:[#allocation3 + $0x68] sm:$0xff]  ;;  %v134_v35 = vmul.f32 %v64_v32, %v64_v32  ;;  %v65_v37 = vld [vmem:[#allocation3 + $0x78] sm:$0xff]  ;;  %v505_v55 = vld [vmem:[%s1237_s2] sm:$0xff]  ;;  %s1187_s2 = sld [smem:[#allocation7]] }
  0x28   :  { %v133_v36 = vmul.f32 %v63_v33, %v63_v33  ;;  %v135_v38 = vmul.f32 %v65_v37, %v65_v37  ;;  %v536_v59 = vsub.s32 2, %v969_v24  ;;  %v543_v61 = vsub.s32 3, %v969_v24 }
  0x29   :  { %140 = vadd.xlane.f32.xlu1 %v122_v7  ;;  %283 = vadd.xlane.f32.xlu0 %v282_v8  ;;  %v70_v34 = vrot.slane %v49_v5, %v972_v29  ;;  %v517_v56 = vstv %s746_s0  ;;  %v529_v62 = vsub.s32 1, %v969_v24  ;;  %v564_v4 = vsub.s32 6, %v969_v24 }
  0x2a   :  { %v518_v57 = vmul.f32 %v517_v56, %v505_v55  ;;  %v571_v6 = vsub.s32 7, %v969_v24 }
  0x2b   :  { %v72_v39 = vmul.f32 %v70_v34, %v50_v1  ;;  %v73_v40 = vmul.f32 %v70_v34, %v51_v0  ;;  %v74_v41 = vmul.f32 %v70_v34, %v52_v2  ;;  %v75_v42 = vmul.f32 %v70_v34, %v53_v10 }
  0x2c   :  { %v76_v43 = vmul.f32 %v70_v34, %v54_v9  ;;  %v77_v44 = vmul.f32 %v70_v34, %v55_v14  ;;  %v78_v45 = vmul.f32 %v70_v34, %v56_v13  ;;  %v79_v46 = vmul.f32 %v70_v34, %v57_v18 }
  0x2d   :  { %144 = vadd.xlane.f32.xlu1 %v124_v11  ;;  %142 = vadd.xlane.f32.xlu0 %v123_v12  ;;  %v80_v47 = vmul.f32 %v70_v34, %v58_v17  ;;  %v81_v48 = vmul.f32 %v70_v34, %v59_v23  ;;  %v82_v49 = vmul.f32 %v70_v34, %v60_v22  ;;  %v550_v0 = vsub.s32 4, %v969_v24 }
  0x2e   :  { %v83_v50 = vmul.f32 %v70_v34, %v61_v28  ;;  %v84_v51 = vmul.f32 %v70_v34, %v62_v27  ;;  %v85_v52 = vmul.f32 %v70_v34, %v63_v33  ;;  %v86_v53 = vmul.f32 %v70_v34, %v64_v32 }
  0x2f   :  { %v87_v54 = vmul.f32 %v70_v34, %v65_v37  ;;  %v523_v58 = vrot.slane %v518_v57, %v972_v29  ;;  %v537_v60 = vrot.slane %v518_v57, %v536_v59  ;;  %v544_v63 = vrot.slane %v518_v57, %v543_v61 }
  0x30   :  { %v530_v1 = vrot.slane %v518_v57, %v529_v62  ;;  %v557_v2 = vsub.s32 5, %v969_v24  ;;  %v551_v3 = vrot.slane %v518_v57, %v550_v0  ;;  %v565_v7 = vrot.slane %v518_v57, %v564_v4 }
  0x31   :  { %148 = vadd.xlane.f32.xlu1 %v126_v15  ;;  %146 = vadd.xlane.f32.xlu0 %v125_v16  ;;  %v572_v8 = vrot.slane %v518_v57, %v571_v6  ;;  %v919_v9 = vmov 0  }
  0x32   :  { %v558_v5 = vrot.slane %v518_v57, %v557_v2  ;;  %753 = vset.pattern.permute.xlu1 %v919_v9  ;;  %754 = vset.pattern.permute.xlu0 %v919_v9 }
  0x35   :  { %152 = vadd.xlane.f32.xlu1 %v128_v20  ;;  %150 = vadd.xlane.f32.xlu0 %v127_v21 }
  0x39   :  { %156 = vadd.xlane.f32.xlu1 %v130_v25  ;;  %154 = vadd.xlane.f32.xlu0 %v129_v26 }
  0x3d   :  { %160 = vadd.xlane.f32.xlu1 %v132_v30  ;;  %158 = vadd.xlane.f32.xlu0 %v131_v31 }
  0x41   :  { %164 = vadd.xlane.f32.xlu1 %v134_v35  ;;  %162 = vadd.xlane.f32.xlu0 %v133_v36 }
  0x45   :  { %166 = vadd.xlane.f32.xlu0 %v135_v38  ;;  %88 = vadd.xlane.f32.xlu1 %v72_v39 }
  0x49   :  { %90 = vadd.xlane.f32.xlu0 %v73_v40  ;;  %92 = vadd.xlane.f32.xlu1 %v74_v41 }
  0x4d   :  { %94 = vadd.xlane.f32.xlu0 %v75_v42  ;;  %96 = vadd.xlane.f32.xlu1 %v76_v43 }
  0x51   :  { %98 = vadd.xlane.f32.xlu0 %v77_v44  ;;  %100 = vadd.xlane.f32.xlu1 %v78_v45 }
  0x55   :  { %102 = vadd.xlane.f32.xlu0 %v79_v46  ;;  %104 = vadd.xlane.f32.xlu1 %v80_v47 }
  0x59   :  { %106 = vadd.xlane.f32.xlu0 %v81_v48  ;;  %108 = vadd.xlane.f32.xlu1 %v82_v49 }
  0x5d   :  { %110 = vadd.xlane.f32.xlu0 %v83_v50  ;;  %112 = vadd.xlane.f32.xlu1 %v84_v51 }
  0x61   :  { %114 = vadd.xlane.f32.xlu0 %v85_v52  ;;  %116 = vadd.xlane.f32.xlu1 %v86_v53 }
  0x65   :  { %118 = vadd.xlane.f32.xlu0 %v87_v54 }
  0x72   :  { %525 = vbcast.lane.b32.xlu1 %v523_v58, 256 }
  0x76   :  { %539 = vbcast.lane.b32.xlu1 %v537_v60, 256 }
  0x7a   :  { %546 = vbcast.lane.b32.xlu1 %v544_v63, 256 }
  0x7b   :  { %532 = vbcast.lane.b32.xlu0 %v530_v1, 256 }
  0x7e   :  { %553 = vbcast.lane.b32.xlu1 %v551_v3, 256 }
  0x7f   :  { %560 = vbcast.lane.b32.xlu0 %v558_v5, 256 }
  0x82   :  { %567 = vbcast.lane.b32.xlu1 %v565_v7, 256 }
  0x83   :  { %574 = vbcast.lane.b32.xlu0 %v572_v8, 256 }
  0xb2   :  { %v139_v10 = vpop.xlane.xlu1 %138  ;;  %v137_v11 = vpop.xlane.xlu0 %136 }
  0xb3   :  { %755 = vrsqrt.f32 %v139_v10  ;;  %vm177_vm1 = vcmp.eq.f32.partialorder %v139_v10, inf  ;;  %vm179_vm2 = vcmp.eq.f32.partialorder %v139_v10, 0.0  ;;  %v180_v21 = vand.u32 2147483648, %v139_v10 }
  0xb4   :  { %757 = vrsqrt.f32 %v137_v11  ;;  %vm170_vm3 = vcmp.eq.f32.partialorder %v137_v11, inf  ;;  %vm172_vm4 = vcmp.eq.f32.partialorder %v137_v11, 0.0  ;;  %v173_v23 = vand.u32 2147483648, %v137_v11 }
  0xb6   :  { %v986_v12 = vpop.xlane.xlu1 %140  ;;  %v284_v13 = vpop.xlane.xlu0 %283 }
  0xb7   :  { %759 = vrsqrt.f32 %v986_v12  ;;  %vm184_vm5 = vcmp.eq.f32.partialorder %v986_v12, inf  ;;  %vm186_vm6 = vcmp.eq.f32.partialorder %v986_v12, 0.0  ;;  %v187_v25 = vand.u32 2147483648, %v986_v12 }
  0xb8   :  { %761 = vrsqrt.f32 %v284_v13  ;;  %vm287_vm7 = vcmp.eq.f32.partialorder %v284_v13, inf  ;;  %vm289_vm8 = vcmp.eq.f32.partialorder %v284_v13, 0.0  ;;  %v290_v30 = vand.u32 2147483648, %v284_v13 }
  0xba   :  { %v989_v14 = vpop.xlane.xlu1 %144  ;;  %v991_v15 = vpop.xlane.xlu0 %142 }
  0xbb   :  { %763 = vrsqrt.f32 %v989_v14  ;;  %vm198_vm9 = vcmp.eq.f32.partialorder %v989_v14, inf  ;;  %vm200_vm10 = vcmp.eq.f32.partialorder %v989_v14, 0.0  ;;  %v201_v34 = vand.u32 2147483648, %v989_v14 }
  0xbc   :  { %765 = vrsqrt.f32 %v991_v15  ;;  %vm191_vm11 = vcmp.eq.f32.partialorder %v991_v15, inf  ;;  %vm193_vm12 = vcmp.eq.f32.partialorder %v991_v15, 0.0  ;;  %v194_v36 = vand.u32 2147483648, %v991_v15 }
  0xbd   :  { %v756_v16 = vpop.eup %755 }
  0xbe   :  { %v758_v17 = vpop.eup %757  ;;  %v176_v18 = vmul.f32 %v756_v16, %v139_v10  ;;  %v995_v19 = vpop.xlane.xlu1 %148 }
  0xbf   :  { %v997_v20 = vpop.xlane.xlu0 %146  ;;  %767 = vrsqrt.f32 %v995_v19  ;;  %v169_v22 = vmul.f32 %v758_v17, %v137_v11  ;;  %vm212_vm13 = vcmp.eq.f32.partialorder %v995_v19, inf  ;;  %v215_v41 = vand.u32 2147483648, %v995_v19 }
  0xc0   :  { %769 = vrsqrt.f32 %v997_v20  ;;  %v178_v27 = vsel %vm177_vm1, %v139_v10, %v176_v18  ;;  %vm205_vm14 = vcmp.eq.f32.partialorder %v997_v20, inf  ;;  %v208_v45 = vand.u32 2147483648, %v997_v20 }
  0xc1   :  { %v760_v24 = vpop.eup %759  ;;  %v171_v35 = vsel %vm170_vm3, %v137_v11, %v169_v22  ;;  %v1021_v38 = vsel %vm179_vm2, %v180_v21, %v178_v27  ;;  %vm214_vm15 = vcmp.eq.f32.partialorder %v995_v19, 0.0  ;;  %vm207_vm0 = vcmp.eq.f32.partialorder %v997_v20, 0.0 }
  0xc2   :  { %v762_v26 = vpop.eup %761  ;;  %v183_v28 = vmul.f32 %v760_v24, %v986_v12  ;;  %v1007_v31 = vpop.xlane.xlu1 %152  ;;  %v174_v48 = vsel %vm172_vm4, %v173_v23, %v171_v35  ;;  %v293_v52 = vmax.f32 %v1021_v38, 1e-08 }
  0xc3   :  { %v1009_v32 = vpop.xlane.xlu0 %150  ;;  %v286_v33 = vmul.f32 %v762_v26, %v284_v13  ;;  %771 = vrsqrt.f32 %v1007_v31  ;;  %vm226_vm1 = vcmp.eq.f32.partialorder %v1007_v31, inf  ;;  %vm228_vm2 = vcmp.eq.f32.partialorder %v1007_v31, 0.0 }
  0xc4   :  { %773 = vrsqrt.f32 %v1009_v32  ;;  %v185_v39 = vsel %vm184_vm5, %v986_v12, %v183_v28  ;;  %v229_v55 = vand.u32 2147483648, %v1007_v31  ;;  %vm219_vm3 = vcmp.eq.f32.partialorder %v1009_v32, inf }
  0xc5   :  { %v764_v37 = vpop.eup %763  ;;  %v288_v40 = vsel %vm287_vm7, %v284_v13, %v286_v33  ;;  %v188_v51 = vsel %vm186_vm6, %v187_v25, %v185_v39  ;;  %v222_v56 = vand.u32 2147483648, %v1009_v32  ;;  %vm221_vm4 = vcmp.eq.f32.partialorder %v1009_v32, 0.0 }
  0xc6   :  { %v766_v42 = vpop.eup %765  ;;  %v291_v43 = vsel %vm289_vm8, %v290_v30, %v288_v40  ;;  %v197_v44 = vmul.f32 %v764_v37, %v989_v14  ;;  %v1032_v46 = vpop.xlane.xlu1 %156  ;;  %v292_v63 = vmax.f32 %v174_v48, 1e-08  ;;  %v294_v1 = vmax.f32 %v188_v51, 1e-08 }
  0xc7   :  { %v1034_v47 = vpop.xlane.xlu0 %154  ;;  %v308_v49 = vmax.f32 %v291_v43, 1e-08  ;;  %v190_v50 = vmul.f32 %v766_v42, %v991_v15  ;;  %775 = vrsqrt.f32 %v1032_v46  ;;  %vm240_vm5 = vcmp.eq.f32.partialorder %v1032_v46, inf }
  0xc8   :  { %777 = vrsqrt.f32 %v1034_v47  ;;  %v199_v54 = vsel %vm198_vm9, %v989_v14, %v197_v44  ;;  %vm242_vm6 = vcmp.eq.f32.partialorder %v1032_v46, 0.0  ;;  %v243_v3 = vand.u32 2147483648, %v1032_v46 }
  0xc9   :  { %v768_v53 = vpop.eup %767  ;;  %v1054_v58 = vrot.slane %v308_v49, %v972_v29  ;;  %v192_v59 = vsel %vm191_vm11, %v991_v15, %v190_v50  ;;  %v1070_v2 = vsel %vm200_vm10, %v201_v34, %v199_v54  ;;  %vm233_vm7 = vcmp.eq.f32.partialorder %v1034_v47, inf }
  0xca   :  { %v770_v57 = vpop.eup %769  ;;  %v211_v60 = vmul.f32 %v768_v53, %v995_v19  ;;  %v1061_v61 = vpop.xlane.xlu1 %160  ;;  %v195_v5 = vsel %vm193_vm12, %v194_v36, %v192_v59  ;;  %vm235_vm8 = vcmp.eq.f32.partialorder %v1034_v47, 0.0  ;;  %v236_v10 = vand.u32 2147483648, %v1034_v47 }
  0xcb   :  { %v1063_v62 = vpop.xlane.xlu0 %158  ;;  %v204_v0 = vmul.f32 %v770_v57, %v997_v20  ;;  %779 = vrsqrt.f32 %v1061_v61  ;;  %v313_v13 = vmul.f32 %v1054_v58, %v292_v63  ;;  %vm254_vm9 = vcmp.eq.f32.partialorder %v1061_v61, inf }
  0xcc   :  { %781 = vrsqrt.f32 %v1063_v62  ;;  %v213_v6 = vsel %vm212_vm13, %v995_v19, %v211_v60  ;;  %v257_v15 = vand.u32 2147483648, %v1061_v61  ;;  %vm256_vm10 = vcmp.eq.f32.partialorder %v1061_v61, 0.0 }
  0xcd   :  { %v772_v4 = vpop.eup %771  ;;  %v206_v8 = vsel %vm205_vm14, %v997_v20, %v204_v0  ;;  %v216_v16 = vsel %vm214_vm15, %v215_v41, %v213_v6  ;;  %vm247_vm11 = vcmp.eq.f32.partialorder %v1063_v62, inf  ;;  %v314_v18 = vmul.f32 %v1054_v58, %v293_v52 }
  0xce   :  { %v774_v7 = vpop.eup %773  ;;  %v225_v9 = vmul.f32 %v772_v4, %v1007_v31  ;;  %v1087_v11 = vpop.xlane.xlu1 %164  ;;  %v209_v22 = vsel %vm207_vm0, %v208_v45, %v206_v8  ;;  %vm249_vm12 = vcmp.eq.f32.partialorder %v1063_v62, 0.0  ;;  %v250_v23 = vand.u32 2147483648, %v1063_v62 }
  0xcf   :  { %v1089_v12 = vpop.xlane.xlu0 %162  ;;  %v218_v14 = vmul.f32 %v774_v7, %v1009_v32  ;;  %783 = vrsqrt.f32 %v1087_v11  ;;  %v271_v24 = vand.u32 2147483648, %v1087_v11  ;;  %v315_v30 = vmul.f32 %v1054_v58, %v294_v1 }
  0xd0   :  { %v227_v17 = vsel %vm226_vm1, %v1007_v31, %v225_v9  ;;  %785 = vrsqrt.f32 %v1089_v12  ;;  %vm268_vm13 = vcmp.eq.f32.partialorder %v1087_v11, inf  ;;  %v264_v35 = vand.u32 2147483648, %v1089_v12 }
  0xd1   :  { %v776_v21 = vpop.eup %775  ;;  %v220_v19 = vsel %vm219_vm3, %v1009_v32, %v218_v14  ;;  %v230_v26 = vsel %vm228_vm2, %v229_v55, %v227_v17  ;;  %787 = vrcp.f32 %v313_v13  ;;  %vm270_vm14 = vcmp.eq.f32.partialorder %v1087_v11, 0.0 }
  0xd2   :  { %v778_v25 = vpop.eup %777  ;;  %v239_v27 = vmul.f32 %v776_v21, %v1032_v46  ;;  %v89_v20 = vpop.xlane.xlu1 %88  ;;  %v223_v33 = vsel %vm221_vm4, %v222_v56, %v220_v19  ;;  %vm261_vm15 = vcmp.eq.f32.partialorder %v1089_v12, inf  ;;  %v295_v32 = vmax.f32 %v195_v5, 1e-08 }
  0xd3   :  { %v1116_v28 = vpop.xlane.xlu0 %166  ;;  %v232_v34 = vmul.f32 %v778_v25, %v1034_v47  ;;  %vm263_vm0 = vcmp.eq.f32.partialorder %v1089_v12, 0.0  ;;  %v296_v40 = vmax.f32 %v1070_v2, 1e-08  ;;  %v297_v48 = vmax.f32 %v209_v22, 1e-08 }
  0xd4   :  { %789 = vrsqrt.f32 %v1116_v28  ;;  %v241_v31 = vsel %vm240_vm5, %v1032_v46, %v239_v27  ;;  %v278_v36 = vand.u32 2147483648, %v1116_v28  ;;  %v316_v46 = vmul.f32 %v1054_v58, %v295_v32 }
  0xd5   :  { %791 = vrcp.f32 %v314_v18  ;;  %v780_v37 = vpop.eup %779  ;;  %v244_v38 = vsel %vm242_vm6, %v243_v3, %v241_v31  ;;  %v234_v39 = vsel %vm233_vm7, %v1034_v47, %v232_v34  ;;  %vm275_vm1 = vcmp.eq.f32.partialorder %v1116_v28, inf }
  0xd6   :  { %793 = vrcp.f32 %v315_v30  ;;  %v782_v41 = vpop.eup %781  ;;  %v237_v42 = vsel %vm235_vm8, %v236_v10, %v234_v39  ;;  %v253_v43 = vmul.f32 %v780_v37, %v1061_v61  ;;  %v93_v45 = vpop.xlane.xlu1 %92  ;;  %v317_v50 = vmul.f32 %v1054_v58, %v296_v40 }
  0xd7   :  { %v91_v44 = vpop.xlane.xlu0 %90  ;;  %v246_v49 = vmul.f32 %v782_v41, %v1063_v62  ;;  %v298_v51 = vmax.f32 %v216_v16, 1e-08  ;;  %v299_v52 = vmax.f32 %v223_v33, 1e-08  ;;  %vm277_vm2 = vcmp.eq.f32.partialorder %v1116_v28, 0.0 }
  0xd8   :  { %v255_v47 = vsel %vm254_vm9, %v1061_v61, %v253_v43  ;;  %795 = vrcp.f32 %v316_v46  ;;  %v318_v53 = vmul.f32 %v1054_v58, %v297_v48  ;;  %v300_v54 = vmax.f32 %v230_v26, 1e-08 }
  0xd9   :  { %v784_v55 = vpop.eup %783  ;;  %v258_v56 = vsel %vm256_vm10, %v257_v15, %v255_v47  ;;  %v248_v57 = vsel %vm247_vm11, %v1063_v62, %v246_v49  ;;  %797 = vrcp.f32 %v317_v50  ;;  %v319_v59 = vmul.f32 %v1054_v58, %v298_v51 }
  0xda   :  { %v786_v60 = vpop.eup %785  ;;  %v251_v63 = vsel %vm249_vm12, %v250_v23, %v248_v57  ;;  %v267_v0 = vmul.f32 %v784_v55, %v1087_v11  ;;  %v97_v2 = vpop.xlane.xlu1 %96  ;;  %799 = vrcp.f32 %v318_v53  ;;  %v320_v3 = vmul.f32 %v1054_v58, %v299_v52 }
  0xdb   :  { %v95_v1 = vpop.xlane.xlu0 %94  ;;  %v260_v61 = vmul.f32 %v786_v60, %v1089_v12  ;;  %801 = vrcp.f32 %v319_v59  ;;  %v321_v4 = vmul.f32 %v1054_v58, %v300_v54  ;;  %v301_v5 = vmax.f32 %v237_v42, 1e-08  ;;  %v788_v6 = vpop.eup %787 }
  0xdc   :  { %v269_v7 = vsel %vm268_vm13, %v1087_v11, %v267_v0  ;;  %803 = vrcp.f32 %v320_v3  ;;  %v302_v62 = vmax.f32 %v244_v38, 1e-08  ;;  %v303_v8 = vmax.f32 %v251_v63, 1e-08 }
  0xdd   :  { %v272_v10 = vsel %vm270_vm14, %v271_v24, %v269_v7  ;;  %v262_v13 = vsel %vm261_vm15, %v1089_v12, %v260_v61  ;;  %v330_v14 = vmul.f32 %v788_v6, %v89_v20  ;;  %805 = vrcp.f32 %v321_v4 }
  0xde   :  { %v790_v9 = vpop.eup %789  ;;  %v265_v16 = vsel %vm263_vm0, %v264_v35, %v262_v13  ;;  %v101_v21 = vpop.xlane.xlu1 %100  ;;  %v322_v22 = vmul.f32 %v1054_v58, %v301_v5  ;;  %v323_v19 = vmul.f32 %v1054_v58, %v302_v62  ;;  %v324_v25 = vmul.f32 %v1054_v58, %v303_v8 }
  0xdf   :  { %v792_v15 = vpop.eup %791  ;;  %v274_v17 = vmul.f32 %v790_v9, %v1116_v28  ;;  %v99_v18 = vpop.xlane.xlu0 %98  ;;  %v361_v23 = vmax.f32 %v330_v14, 0.0  ;;  %v304_v26 = vmax.f32 %v258_v56, 1e-08  ;;  %v305_v20 = vmax.f32 %v265_v16, 1e-08 }
  0xe0   :  { %v794_v11 = vpop.eup %793  ;;  %v332_v24 = vmul.f32 %v792_v15, %v91_v44  ;;  %807 = vrcp.f32 %v322_v22  ;;  %v306_v43 = vmax.f32 %v272_v10, 1e-08  ;;  %v1192_v22 = vstv %s1187_s2 }
  0xe1   :  { %v276_v27 = vsel %vm275_vm1, %v1116_v28, %v274_v17  ;;  %v334_v12 = vmul.f32 %v794_v11, %v93_v45  ;;  %v377_v33 = vsub.f32 1.0, %v361_v23  ;;  %809 = vrcp.f32 %v323_v19 }
  0xe2   :  { %v279_v30 = vsel %vm277_vm2, %v278_v36, %v276_v27  ;;  %v362_v34 = vmax.f32 %v332_v24, 0.0  ;;  %v796_v35 = vpop.eup %795  ;;  %v105_v37 = vpop.xlane.xlu1 %104  ;;  %811 = vrcp.f32 %v324_v25  ;;  %v325_v38 = vmul.f32 %v1054_v58, %v304_v26 }
  0xe3   :  { %v363_v31 = vmax.f32 %v334_v12, 0.0  ;;  %v103_v32 = vpop.xlane.xlu0 %102  ;;  %v326_v39 = vmul.f32 %v1054_v58, %v305_v20  ;;  %v798_v40 = vpop.eup %797  ;;  %v336_v42 = vmul.f32 %v796_v35, %v95_v1  ;;  %v307_v44 = vmax.f32 %v279_v30, 1e-08 }
  0xe4   :  { %v378_v41 = vsub.f32 1.0, %v362_v34  ;;  %v800_v45 = vpop.eup %799  ;;  %v338_v36 = vmul.f32 %v798_v40, %v97_v2  ;;  %813 = vrcp.f32 %v325_v38  ;;  %v327_v55 = vmul.f32 %v1054_v58, %v306_v43 }
  0xe5   :  { %v379_v28 = vsub.f32 1.0, %v363_v31  ;;  %v802_v46 = vpop.eup %801  ;;  %v364_v49 = vmax.f32 %v336_v42, 0.0  ;;  %v340_v50 = vmul.f32 %v800_v45, %v99_v18  ;;  %815 = vrcp.f32 %v326_v39 }
  0xe6   :  { %v393_v48 = vmul.f32 %v378_v41, %v377_v33  ;;  %v804_v51 = vpop.eup %803  ;;  %v365_v52 = vmax.f32 %v338_v36, 0.0  ;;  %v342_v47 = vmul.f32 %v802_v46, %v101_v21  ;;  %v109_v54 = vpop.xlane.xlu1 %108  ;;  %v328_v56 = vmul.f32 %v1054_v58, %v307_v44 }
  0xe7   :  { %v107_v53 = vpop.xlane.xlu0 %106  ;;  %v806_v57 = vpop.eup %805  ;;  %v380_v60 = vsub.f32 1.0, %v364_v49  ;;  %v366_v63 = vmax.f32 %v340_v50, 0.0  ;;  %v344_v0 = vmul.f32 %v804_v51, %v103_v32  ;;  %817 = vrcp.f32 %v327_v55 }
  0xe8   :  { %v409_v59 = vrot.slane %v393_v48, 4  ;;  %v381_v1 = vsub.f32 1.0, %v365_v52  ;;  %v367_v2 = vmax.f32 %v342_v47, 0.0  ;;  %v346_v3 = vmul.f32 %v806_v57, %v105_v37 }
  0xe9   :  { %v394_v4 = vmul.f32 %v380_v60, %v379_v28  ;;  %v382_v5 = vsub.f32 1.0, %v366_v63  ;;  %v368_v6 = vmax.f32 %v344_v0, 0.0  ;;  %819 = vrcp.f32 %v328_v56 }
  0xea   :  { %v425_v61 = vmul.f32 %v409_v59, %v393_v48  ;;  %v808_v7 = vpop.eup %807  ;;  %v383_v62 = vsub.f32 1.0, %v367_v2  ;;  %v369_v8 = vmax.f32 %v346_v3, 0.0  ;;  %v113_v10 = vpop.xlane.xlu1 %112  ;;  %v1197_v19 = vstv %s1239_s4  ;;  %s920_s4 = smov [#allocation8]  }
  0xeb   :  { %v111_v9 = vpop.xlane.xlu0 %110  ;;  %v810_v58 = vpop.eup %809  ;;  %v410_v14 = vrot.slane %v394_v4, 4  ;;  %v395_v15 = vmul.f32 %v382_v5, %v381_v1  ;;  %v384_v16 = vsub.f32 1.0, %v368_v6  ;;  %v348_v18 = vmul.f32 %v808_v7, %v107_v53  ;;  %s736_s16 = sshll.u32 %s920_s4, 4  ;;  %s737_s16 = int_to_ptr.vmem [resolvable:$true] %s736_s16 }
  0xec   :  { %v441_v13 = vrot.slane %v425_v61, 2  ;;  %v812_v17 = vpop.eup %811  ;;  %v350_v21 = vmul.f32 %v810_v58, %v109_v54  ;;  %v385_v27 = vsub.f32 1.0, %v369_v8  ;;  %vm714_vm3 = vcmask 1041409   ;;  %s887_s17 = scalar_lea.vmem %s737_s16, 128  ;;  %p892_p0 = scmp.lt.s32.totalorder %s737_s16, %s737_s16 }
  0xed   :  { %v426_v11 = vmul.f32 %v410_v14, %v394_v4  ;;  %v411_v23 = vrot.slane %v395_v15, 4  ;;  %v396_v24 = vmul.f32 %v384_v16, %v383_v62  ;;  %v352_v25 = vmul.f32 %v812_v17, %v111_v9  ;;  %p888_p13 = scmp.ne.s32.totalorder %s737_s16, %s887_s17  ;;  %p893_p1 = scmp.lt.s32.totalorder %s887_s17, %s887_s17 }
  0xee   :  { %v814_v26 = vpop.eup %813  ;;  %v370_v12 = vmax.f32 %v348_v18, 0.0  ;;  %v371_v20 = vmax.f32 %v350_v21, 0.0  ;;  %v117_v33 = vpop.xlane.xlu1 %116  ;;  %v457_v34 = vmul.f32 %v441_v13, %v425_v61  ;;  %vm716_vm4 = vcmask 1042434  }
  0xef   :  { %v115_v30 = vpop.xlane.xlu0 %114  ;;  %v816_v35 = vpop.eup %815  ;;  %v442_v31 = vrot.slane %v426_v11, 2  ;;  %v427_v32 = vmul.f32 %v411_v23, %v395_v15  ;;  %v412_v37 = vrot.slane %v396_v24, 4  ;;  %v372_v38 = vmax.f32 %v352_v25, 0.0  ;;  %p894_p2 = por %p893_p1, %p892_p0 }
  0xf0   :  { %v386_v39 = vsub.f32 1.0, %v370_v12  ;;  %v387_v40 = vsub.f32 1.0, %v371_v20  ;;  %v354_v41 = vmul.f32 %v814_v26, %v113_v10  ;;  %v356_v42 = vmul.f32 %v816_v35, %v115_v30 }
  0xf1   :  { %v443_v43 = vrot.slane %v427_v32, 2  ;;  %v428_v44 = vmul.f32 %v412_v37, %v396_v24  ;;  %v388_v45 = vsub.f32 1.0, %v372_v38  ;;  %v473_v28 = vrot.slane %v457_v34, 1  ;;  %v818_v36 = vpop.eup %817  ;;  %p895_p3 = pnand %p894_p2, %p888_p13 }
  0xf2   :  { %v397_v46 = vmul.f32 %v386_v39, %v385_v27  ;;  %v373_v48 = vmax.f32 %v354_v41, 0.0  ;;  %v374_v49 = vmax.f32 %v356_v42, 0.0  ;;  %v526_v51 = vpop.permute.xlu1 %525  ;;  %v458_v52 = vmul.f32 %v442_v31, %v426_v11 }
  0xf3   :  { %v119_v50 = vpop.xlane.xlu0 %118  ;;  %v444_v47 = vrot.slane %v428_v44, 2  ;;  %v398_v53 = vmul.f32 %v388_v45, %v387_v40  ;;  %v358_v54 = vmul.f32 %v818_v36, %v117_v33  ;;  %v489_v55 = vmul.f32 %v473_v28, %v457_v34  ;;  %v820_v56 = vpop.eup %819 }
  0xf4   :  { %v413_v57 = vrot.slane %v397_v46, 4  ;;  %v389_v59 = vsub.f32 1.0, %v373_v48  ;;  %v390_v60 = vsub.f32 1.0, %v374_v49  ;;  %v474_v63 = vrot.slane %v458_v52, 1 }
  0xf5   :  { %v414_v0 = vrot.slane %v398_v53, 4  ;;  %v375_v1 = vmax.f32 %v358_v54, 0.0  ;;  %v360_v2 = vmul.f32 %v820_v56, %v119_v50  ;;  %v497_v3 = vsub.f32 1.0, %v489_v55 }
  0xf6   :  { %v429_v61 = vmul.f32 %v413_v57, %v397_v46  ;;  %v399_v4 = vmul.f32 %v390_v60, %v389_v59  ;;  %v490_v5 = vmul.f32 %v474_v63, %v458_v52  ;;  %v459_v6 = vmul.f32 %v443_v43, %v427_v32  ;;  %v540_v7 = vpop.permute.xlu1 %539 }
  0xf7   :  { %v430_v62 = vmul.f32 %v414_v0, %v398_v53  ;;  %v391_v8 = vsub.f32 1.0, %v375_v1  ;;  %v376_v9 = vmax.f32 %v360_v2, 0.0  ;;  %v508_v10 = vmul.f32 %v1192_v22, %v497_v3  ;;  %v533_v21 = vpop.permute.xlu0 %532 }
  0xf8   :  { %v445_v58 = vrot.slane %v429_v61, 2  ;;  %v415_v13 = vrot.slane %v399_v4, 4  ;;  %v498_v14 = vsub.f32 1.0, %v490_v5  ;;  %v475_v15 = vrot.slane %v459_v6, 1 }
  0xf9   :  { %v446_v16 = vrot.slane %v430_v62, 2  ;;  %v392_v17 = vsub.f32 1.0, %v376_v9  ;;  %v584_v18 = vadd.f32 %v526_v51, %v508_v10  ;;  %v460_v11 = vmul.f32 %v444_v47, %v428_v44 }
  0xfa   :  { %v431_v23 = vmul.f32 %v415_v13, %v399_v4  ;;  %v509_v24 = vmul.f32 %v1192_v22, %v498_v14  ;;  %v491_v25 = vmul.f32 %v475_v15, %v459_v6  ;;  %v461_v26 = vmul.f32 %v445_v58, %v429_v61  ;;  %v547_v30 = vpop.permute.xlu1 %546 }
  0xfb   :  { %v400_v27 = vmul.f32 %v392_v17, %v391_v8  ;;  %v594_v12 = vadd.f32 %v1197_v19, %v584_v18  ;;  %v476_v20 = vrot.slane %v460_v11, 1  ;;  %v462_v33 = vmul.f32 %v446_v16, %v430_v62  ;;  %v561_v59 = vpop.permute.xlu0 %560 }
  0xfc   :  { %v447_v34 = vrot.slane %v431_v23, 2  ;;  %v585_v35 = vadd.f32 %v533_v21, %v509_v24  ;;  %v499_v31 = vsub.f32 1.0, %v491_v25  ;;  %v477_v32 = vrot.slane %v461_v26, 1 }
  0xfd   :  { %v416_v37 = vrot.slane %v400_v27, 4  ;;  %v602_v38 = vsub.f32 0.0, %v594_v12  ;;  %v492_v39 = vmul.f32 %v476_v20, %v460_v11  ;;  %v478_v40 = vrot.slane %v462_v33, 1 }
  0xfe   :  { %v595_v41 = vadd.f32 %v1197_v19, %v585_v35  ;;  %v510_v42 = vmul.f32 %v1192_v22, %v499_v31  ;;  %v493_v43 = vmul.f32 %v477_v32, %v461_v26  ;;  %v463_v44 = vmul.f32 %v447_v34, %v431_v23  ;;  %v554_v53 = vpop.permute.xlu1 %553 }
  0xff   :  { %v432_v45 = vmul.f32 %v416_v37, %v400_v27  ;;  %v610_v28 = vmul.f32 1.442695, %v602_v38  ;;  %v500_v36 = vsub.f32 1.0, %v492_v39  ;;  %v494_v46 = vmul.f32 %v478_v40, %v462_v33  ;;  %v575_v23 = vpop.permute.xlu0 %574 }
 0x100   :  { %v603_v48 = vsub.f32 0.0, %v595_v41  ;;  %v586_v49 = vadd.f32 %v540_v7, %v510_v42  ;;  %v501_v50 = vsub.f32 1.0, %v493_v43  ;;  %v479_v51 = vrot.slane %v463_v44, 1 }
 0x101   :  { %v448_v52 = vrot.slane %v432_v45, 2  ;;  %821 = vpow2.f32 %v610_v28  ;;  %v511_v47 = vmul.f32 %v1192_v22, %v500_v36  ;;  %v502_v54 = vsub.f32 1.0, %v494_v46 }
 0x102   :  { %v612_v55 = vmul.f32 1.442695, %v603_v48  ;;  %v596_v56 = vadd.f32 %v1197_v19, %v586_v49  ;;  %v512_v57 = vmul.f32 %v1192_v22, %v501_v50  ;;  %v495_v60 = vmul.f32 %v479_v51, %v463_v44  ;;  %v568_v6 = vpop.permute.xlu1 %567 }
 0x103   :  { %v587_v63 = vadd.f32 %v547_v30, %v511_v47  ;;  %v513_v0 = vmul.f32 %v1192_v22, %v502_v54  ;;  %v464_v1 = vmul.f32 %v448_v52, %v432_v45  ;;  %vm718_vm5 = vcmask 1043459  }
 0x104   :  { %823 = vpow2.f32 %v612_v55  ;;  %v604_v2 = vsub.f32 0.0, %v596_v56  ;;  %v588_v3 = vadd.f32 %v554_v53, %v512_v57  ;;  %v503_v61 = vsub.f32 1.0, %v495_v60 }
 0x105   :  { %v597_v4 = vadd.f32 %v1197_v19, %v587_v63  ;;  %v589_v5 = vadd.f32 %v561_v59, %v513_v0  ;;  %v480_v7 = vrot.slane %v464_v1, 1  ;;  %vm720_vm6 = vcmask 1044484  }
 0x106   :  { %v614_v62 = vmul.f32 1.442695, %v604_v2  ;;  %v598_v8 = vadd.f32 %v1197_v19, %v588_v3  ;;  %v514_v9 = vmul.f32 %v1192_v22, %v503_v61  ;;  %vm722_vm7 = vcmask 1045509  }
 0x107   :  { %v605_v10 = vsub.f32 0.0, %v597_v4  ;;  %v599_v58 = vadd.f32 %v1197_v19, %v589_v5  ;;  %v496_v13 = vmul.f32 %v480_v7, %v464_v1  ;;  %vm724_vm8 = vcmask 1046534  }
 0x108   :  { %825 = vpow2.f32 %v614_v62  ;;  %v606_v14 = vsub.f32 0.0, %v598_v8  ;;  %v590_v15 = vadd.f32 %v568_v6, %v514_v9  ;;  %vm726_vm9 = vcmask 1047559  }
 0x109   :  { %v616_v16 = vmul.f32 1.442695, %v605_v10  ;;  %v607_v17 = vsub.f32 0.0, %v599_v58  ;;  %v504_v18 = vsub.f32 1.0, %v496_v13 }
 0x10a   :  { %v618_v21 = vmul.f32 1.442695, %v606_v14  ;;  %v600_v11 = vadd.f32 %v1197_v19, %v590_v15 }
 0x10b   :  { %v822_v24 = vpop.eup %821  ;;  %827 = vpow2.f32 %v616_v16  ;;  %v620_v25 = vmul.f32 1.442695, %v607_v17  ;;  %v515_v26 = vmul.f32 %v1192_v22, %v504_v18 }
 0x10c   :  { %v626_v27 = vadd.f32 1.0, %v822_v24  ;;  %829 = vpow2.f32 %v618_v21  ;;  %v608_v12 = vsub.f32 0.0, %v600_v11 }
 0x10d   :  { %831 = vpow2.f32 %v620_v25  ;;  %v591_v20 = vadd.f32 %v575_v23, %v515_v26 }
 0x10e   :  { %v824_v30 = vpop.eup %823  ;;  %833 = vrcp.f32 %v626_v27  ;;  %v622_v33 = vmul.f32 1.442695, %v608_v12 }
 0x10f   :  { %v627_v34 = vadd.f32 1.0, %v824_v30  ;;  %v601_v35 = vadd.f32 %v1197_v19, %v591_v20 }
 0x110   :  { %835 = vpow2.f32 %v622_v33 }
 0x111   :  { %837 = vrcp.f32 %v627_v34  ;;  %v609_v31 = vsub.f32 0.0, %v601_v35 }
 0x112   :  { %v826_v32 = vpop.eup %825 }
 0x113   :  { %v628_v37 = vadd.f32 1.0, %v826_v32  ;;  %v624_v38 = vmul.f32 1.442695, %v609_v31 }
 0x115   :  { %v828_v39 = vpop.eup %827  ;;  %839 = vrcp.f32 %v628_v37 }
 0x116   :  { %v830_v22 = vpop.eup %829  ;;  %v629_v40 = vadd.f32 1.0, %v828_v39  ;;  %841 = vpow2.f32 %v624_v38 }
 0x117   :  { %v832_v41 = vpop.eup %831  ;;  %v630_v42 = vadd.f32 1.0, %v830_v22 }
 0x118   :  { %v834_v43 = vpop.eup %833  ;;  %843 = vrcp.f32 %v629_v40  ;;  %v631_v44 = vadd.f32 1.0, %v832_v41 }
 0x119   :  { %845 = vrcp.f32 %v630_v42  ;;  %v653_v45 = vrot.slane %v834_v43, %v972_v29 }
 0x11a   :  { %v836_v19 = vpop.eup %835  ;;  %847 = vrcp.f32 %v631_v44 }
 0x11b   :  { %v838_v28 = vpop.eup %837  ;;  %v632_v36 = vadd.f32 1.0, %v836_v19  ;;  %691 = vperm.xlu1 %753, %v653_v45  }
 0x11c   :  { %v657_v46 = vrot.slane %v838_v28, %v972_v29 }
 0x11d   :  { %849 = vrcp.f32 %v632_v36 }
 0x11e   :  { %694 = vperm.xlu0 %754, %v657_v46  }
 0x11f   :  { %v840_v48 = vpop.eup %839 }
 0x120   :  { %v842_v49 = vpop.eup %841  ;;  %v661_v50 = vrot.slane %v840_v48, %v972_v29 }
 0x121   :  { %v633_v51 = vadd.f32 1.0, %v842_v49 }
 0x122   :  { %v844_v52 = vpop.eup %843  ;;  %697 = vperm.xlu1 %753, %v661_v50  }
 0x123   :  { %v846_v47 = vpop.eup %845  ;;  %851 = vrcp.f32 %v633_v51  ;;  %v665_v53 = vrot.slane %v844_v52, %v972_v29 }
 0x124   :  { %v848_v54 = vpop.eup %847  ;;  %v669_v55 = vrot.slane %v846_v47, %v972_v29 }
 0x125   :  { %v673_v56 = vrot.slane %v848_v54, %v972_v29 }
 0x126   :  { %700 = vperm.xlu1 %753, %v665_v53   ;;  %703 = vperm.xlu0 %754, %v669_v55  }
 0x127   :  { %v850_v57 = vpop.eup %849 }
 0x128   :  { %v677_v59 = vrot.slane %v850_v57, %v972_v29 }
 0x12a   :  { %706 = vperm.xlu1 %753, %v673_v56   ;;  %709 = vperm.xlu0 %754, %v677_v59  }
 0x12d   :  { %v852_v60 = vpop.eup %851 }
 0x12e   :  { %v681_v63 = vrot.slane %v852_v60, %v972_v29 }
 0x130   :  { %712 = vperm.xlu1 %753, %v681_v63  }
 0x19a   :  { %v692_v0 = vpop.permute.xlu1 %691 }
 0x19d   :  { %v695_v2 = vpop.permute.xlu0 %694 }
 0x19e   :  { %v715_v61 = vsel %vm714_vm3, %v695_v2, %v692_v0 }
 0x1a1   :  { %v698_v1 = vpop.permute.xlu1 %697 }
 0x1a2   :  { %v717_v5 = vsel %vm716_vm4, %v698_v1, %v715_v61 }
 0x1a5   :  { %v701_v3 = vpop.permute.xlu1 %700  ;;  %v704_v4 = vpop.permute.xlu0 %703 }
 0x1a6   :  { %v719_v7 = vsel %vm718_vm5, %v701_v3, %v717_v5 }
 0x1a7   :  { %v721_v29 = vsel %vm720_vm6, %v704_v4, %v719_v7 }
 0x1a9   :  { %v707_v6 = vpop.permute.xlu1 %706  ;;  %v710_v62 = vpop.permute.xlu0 %709 }
 0x1aa   :  { %v723_v8 = vsel %vm722_vm7, %v707_v6, %v721_v29 }
 0x1ab   :  { %v725_v9 = vsel %vm724_vm8, %v710_v62, %v723_v8 }
 0x1af   :  { %v713_v10 = vpop.permute.xlu1 %712 }
 0x1b0   :  { %v727_v58 = vsel %vm726_vm9, %v713_v10, %v725_v9 }
 0x1b1   :  { %729 = vst [vmem:[#allocation8] sm:$0xff] %v727_v58 }
 0x1b2   :  { %898 = shalt.err (!%p895_p3)
}
 0x1b3   :  { %s899_s20 = scalar_lea.hbm %s1240_s5, 128 }
 0x1b4   :  { %p900_p4 = scmp.ne.s32.totalorder %s1240_s5, %s899_s20  ;;  %p903_p5 = scmp.lt.u32.totalorder %s899_s20, %s1240_s5 }
 0x1b6   :  { %p905_p6 = pnand %p903_p5, %p900_p4 }
 0x1b8   :  { %908 = shalt.err (!%p905_p6)
}
 0x1b9   :  { %739 = dma.vmem_to_hbm [thread:$0]  %s737_s16, 128, %s1240_s5, [#allocation5]  }
 0x1ba   :  { %913 = dma.done.wait [#allocation5], 128  }
 0x1bb   :  { %914 = vsyncadd [#allocation5], 4294967168 }
 0x1bc   :  { %743 = vsyncpa [#allocation4], 1 }
 0x1bd   :  { %744 = vsyncpa [#allocation5], 1 }
 0x1be   :  { %745 = vsyncpa [#allocation6], 1 }

</bundles_post_ra>
